<compile_context>
chip_gen: v7x
topology: tpu7x:2x2x1
jax: 0.10.0
libtpu: 0.0.40
codegen_flags: <defaults>
</compile_context>

<pallas_src>
import functools

import jax
import jax.numpy as jnp
from jax import lax
from jax.experimental import pallas as pl
from jax.experimental.pallas import tpu as pltpu

LANE = 128     # lane width: pad hidden dim to a multiple of this
SUBLANE = 8    # sublane width: pad batch to a multiple of this


def _round_up(x, m):
    return (x + m - 1) // m * m


# --------------------------------------------------------------------------------------
# Generic single-block dense kernel:  out = x @ w + b      (used for the hoisted input
# projections and the decoder output projection -- one big matmul per sequence)
# --------------------------------------------------------------------------------------
def _dense_kernel(x_ref, w_ref, b_ref, o_ref):
    o_ref[...] = (jnp.dot(x_ref[...], w_ref[...], preferred_element_type=jnp.float32)
                  + b_ref[...]).astype(o_ref.dtype)


def dense(x, w, b):
    """x: (M, K), w: (K, N), b: (1, N) -> (M, N) float32. Whole arrays fit VMEM here."""
    M, K = x.shape
    N = w.shape[1]
    return pl.pallas_call(
        _dense_kernel,
        grid=(1,),
        in_specs=[
            pl.BlockSpec((M, K), lambda i: (0, 0)),
            pl.BlockSpec((K, N), lambda i: (0, 0)),
            pl.BlockSpec((1, N), lambda i: (0, 0)),
        ],
        out_specs=pl.BlockSpec((M, N), lambda i: (0, 0)),
        out_shape=jax.ShapeDtypeStruct((M, N), jnp.float32),
    )(x, w, b)


# --------------------------------------------------------------------------------------
# Recurrent GRU kernel: one block of time steps per grid iteration.
#   gi_ref   : (T_blk, Bp, 3*Hp)  precomputed input projections (b_ih already folded in)
#   h0_ref   : (Bp, Hp)           initial hidden state (resident)
#   whh_ref  : (Hp, 3*Hp)         W_hh^T, gate-packed, lane-aligned (resident)
#   bhh_ref  : (1, 3*Hp)          b_hh, gate-packed (resident)
#   hall_ref : (T_blk, Bp, Hp)    all hidden states for this time block
#   hlast_ref: (Bp, Hp)           resident carry / final hidden state (no scratch needed)
# Gate order follows PyTorch nn.GRU: r, z, n  (b_hn stays inside the r multiplication).
# --------------------------------------------------------------------------------------
def _gru_seq_kernel(gi_ref, h0_ref, whh_ref, bhh_ref, hall_ref, hlast_ref, *, t_blk):
    blk = pl.program_id(0)

    @pl.when(blk == 0)
    def _():
        hlast_ref[...] = h0_ref[...]

    Bp, Hp = hlast_ref.shape
    whh = whh_ref[...]                                        # resident weights
    bhh = jnp.broadcast_to(bhh_ref[...], (Bp, 3 * Hp))        # hoisted broadcast

    def step(i, h):
        gi = gi_ref[i]                                        # (Bp, 3Hp), lane-dense
        gh = jnp.dot(h, whh, preferred_element_type=jnp.float32) + bhh
        i_r, i_z, i_n = gi[:, :Hp], gi[:, Hp:2 * Hp], gi[:, 2 * Hp:]
        h_r, h_z, h_n = gh[:, :Hp], gh[:, Hp:2 * Hp], gh[:, 2 * Hp:]
        r = jax.nn.sigmoid(i_r + h_r)
        z = jax.nn.sigmoid(i_z + h_z)
        n = jnp.tanh(i_n + r * h_n)
        h_new = (1.0 - z) * n + z * h
        hall_ref[i] = h_new
        return h_new

    h_final = lax.fori_loop(0, t_blk, step, hlast_ref[...], unroll=True)
    hlast_ref[...] = h_final


def _run_gru(gi_sbg, h0, whh_t, bhh, *, t_blk=16):
    """gi_sbg: (S, Bp, 3*Hp) time-major input projections; h0: (Bp, Hp).
    Returns (h_all (S, Bp, Hp), h_last (Bp, Hp))."""
    S, Bp, _ = gi_sbg.shape
    Hp = whh_t.shape[0]
    t_blk = min(t_blk, S)
    S_pad = _round_up(S, t_blk)
    if S_pad != S:
        # Pad with exact identity steps: huge z-gate preactivation -> z == 1 -> h_new == h.
        pad = jnp.zeros((S_pad - S, Bp, 3, Hp), jnp.float32).at[:, :, 1, :].set(1e4)
        gi_sbg = jnp.concatenate([gi_sbg, pad.reshape(S_pad - S, Bp, 3 * Hp)], axis=0)
    n_blk = S_pad // t_blk

    kernel = functools.partial(_gru_seq_kernel, t_blk=t_blk)
    h_all, h_last = pl.pallas_call(
        kernel,
        grid_spec=pltpu.PrefetchScalarGridSpec(
            num_scalar_prefetch=0,
            grid=(n_blk,),
            in_specs=[
                pl.BlockSpec((t_blk, Bp, 3 * Hp), lambda b: (b, 0, 0)),  # gi block
                pl.BlockSpec((Bp, Hp), lambda b: (0, 0)),                # h0 (resident)
                pl.BlockSpec((Hp, 3 * Hp), lambda b: (0, 0)),            # W_hh^T (resident)
                pl.BlockSpec((1, 3 * Hp), lambda b: (0, 0)),             # b_hh (resident)
            ],
            out_specs=[
                pl.BlockSpec((t_blk, Bp, Hp), lambda b: (b, 0, 0)),      # all hidden states
                pl.BlockSpec((Bp, Hp), lambda b: (0, 0)),                # carried last state
            ],
        ),
        out_shape=(jax.ShapeDtypeStruct((S_pad, Bp, Hp), jnp.float32),
                   jax.ShapeDtypeStruct((Bp, Hp), jnp.float32)),
        compiler_params=pltpu.CompilerParams(
            dimension_semantics=("arbitrary",)),   # sequential recurrence over time blocks
    )(gi_sbg, h0, whh_t, bhh)
    return h_all[:S], h_last


# --------------------------------------------------------------------------------------
# Parameter packing: PyTorch GRU layout -> transposed, gate-packed, lane-aligned layout.
# --------------------------------------------------------------------------------------
def _pack_gru_weights(w_ih, w_hh, b_ih, b_hh, Hp):
    """w_ih: (3H, E), w_hh: (3H, H), b_*: (3H,) ->
       wih_t: (E, 3Hp), whh_t: (Hp, 3Hp), bih: (1, 3Hp), bhh: (1, 3Hp)
       with each gate in its own Hp-wide (lane-aligned) column block."""
    H = w_hh.shape[1]
    E = w_ih.shape[1]
    wih_g = jnp.transpose(w_ih).reshape(E, 3, H)
    whh_g = jnp.transpose(w_hh).reshape(H, 3, H)
    wih_t = jnp.zeros((E, 3, Hp), jnp.float32).at[:, :, :H].set(wih_g).reshape(E, 3 * Hp)
    whh_t = jnp.zeros((Hp, 3, Hp), jnp.float32).at[:H, :, :H].set(whh_g).reshape(Hp, 3 * Hp)
    bih = jnp.zeros((1, 3, Hp), jnp.float32).at[0, :, :H].set(b_ih.reshape(3, H)).reshape(1, 3 * Hp)
    bhh = jnp.zeros((1, 3, Hp), jnp.float32).at[0, :, :H].set(b_hh.reshape(3, H)).reshape(1, 3 * Hp)
    return wih_t, whh_t, bih, bhh


# --------------------------------------------------------------------------------------
# Seq2Seq forward (matches PyTorch Seq2Seq.forward: returns cat of decoder logits)
# --------------------------------------------------------------------------------------
def seq2seq_forward(params, src, tgt, max_ans_letters, *, t_blk=16):
    enc, dec = params["enc"], params["dec"]
    B = src.shape[0]
    H = enc["w_hh"].shape[1]                 # hidden size (fix: shape[1], not shape[0])
    assert dec["w_hh"].shape[1] == H, "encoder/decoder hidden dims must match"
    Hp = max(_round_up(H, LANE), LANE)
    Bp = max(_round_up(B, SUBLANE), SUBLANE)
    T = max_ans_letters - 1

    e_wih, e_whh, e_bih, e_bhh = _pack_gru_weights(
        enc["w_ih"], enc["w_hh"], enc["b_ih"], enc["b_hh"], Hp)
    d_wih, d_whh, d_bih, d_bhh = _pack_gru_weights(
        dec["w_ih"], dec["w_hh"], dec["b_ih"], dec["b_hh"], Hp)
    V_tgt = dec["w_out"].shape[0]
    w_out_t = jnp.zeros((Hp, V_tgt), jnp.float32).at[:H, :].set(jnp.transpose(dec["w_out"]))
    b_out = dec["b_out"].reshape(1, V_tgt)

    def embed_time_major(emb, tokens):
        # TODO(synk): fuse this embedding gather into the GRU pipeline via a
        # scalar-prefetch / DMA-gather index_map instead of materializing (B,S,E) in HBM.
        x = emb[tokens]                                    # (B, S, E)
        x = jnp.pad(x, ((0, Bp - B), (0, 0), (0, 0)))      # pad batch to sublane multiple
        return jnp.transpose(x, (1, 0, 2))                 # (S, Bp, E) time-major

    # ---------------- Encoder ----------------
    x_src = embed_time_major(enc["emb"], src)                          # (S, Bp, E)
    S, _, E_enc = x_src.shape
    gi_enc = dense(x_src.reshape(S * Bp, E_enc), e_wih, e_bih)         # hoisted input proj
    gi_enc = gi_enc.reshape(S, Bp, 3 * Hp)
    h0 = jnp.zeros((Bp, Hp), jnp.float32)                              # h0 = zeros
    _, h_enc = _run_gru(gi_enc, h0, e_whh, e_bhh, t_blk=t_blk)         # (Bp, Hp)

    # ---------------- Decoder (teacher forcing over tgt[:, :T]) ----------------
    x_tgt = embed_time_major(dec["emb"], tgt[:, :T])                   # (T, Bp, E)
    _, _, E_dec = x_tgt.shape
    gi_dec = dense(x_tgt.reshape(T * Bp, E_dec), d_wih, d_bih).reshape(T, Bp, 3 * Hp)
    h_all, _ = _run_gru(gi_dec, h_enc, d_whh, d_bhh, t_blk=t_blk)      # (T, Bp, Hp)

    # Output projection over all decoder steps in one matmul.
    logits = dense(h_all.reshape(T * Bp, Hp), w_out_t, b_out)          # (T*Bp, V)
    logits = logits.reshape(T, Bp, V_tgt)[:, :B].transpose(1, 0, 2)    # (B, T, V)
    return logits


# --------------------------------------------------------------------------------------
# Parameter init (mirrors nn.Embedding / nn.GRU / nn.Linear defaults)
# --------------------------------------------------------------------------------------
def init_params(key, src_vocab, tgt_vocab, enc_emb, enc_hid, dec_emb, dec_hid, pad_idx):
    ks = jax.random.split(key, 6)

    def gru_params(k, in_dim, hid):
        k1, k2, k3, k4 = jax.random.split(k, 4)
        s = 1.0 / jnp.sqrt(hid)
        return dict(
            w_ih=jax.random.uniform(k1, (3 * hid, in_dim), jnp.float32, -s, s),
            w_hh=jax.random.uniform(k2, (3 * hid, hid), jnp.float32, -s, s),
            b_ih=jax.random.uniform(k3, (3 * hid,), jnp.float32, -s, s),
            b_hh=jax.random.uniform(k4, (3 * hid,), jnp.float32, -s, s),
        )

    enc_emb_w = jax.random.normal(ks[0], (src_vocab, enc_emb), jnp.float32).at[pad_idx].set(0.0)
    dec_emb_w = jax.random.normal(ks[1], (tgt_vocab, dec_emb), jnp.float32).at[pad_idx].set(0.0)
    so = 1.0 / jnp.sqrt(dec_hid)
    enc_d = dict(emb=enc_emb_w, **gru_params(ks[2], enc_emb, enc_hid))
    dec_d = dict(emb=dec_emb_w, **gru_params(ks[3], dec_emb, dec_hid),
                 w_out=jax.random.uniform(ks[4], (tgt_vocab, dec_hid), jnp.float32, -so, so),
                 b_out=jax.random.uniform(ks[5], (tgt_vocab,), jnp.float32, -so, so))
    return dict(enc=enc_d, dec=dec_d)


# --------------------------------------------------------------------------------------
# Pure-JAX reference (fp32) for verification
# --------------------------------------------------------------------------------------
def _reference_forward(params, src, tgt, max_ans_letters):
    def gru_scan(x_bse, h0, w_ih, w_hh, b_ih, b_hh):
        def step(h, x_t):
            gi = x_t @ w_ih.T + b_ih
            gh = h @ w_hh.T + b_hh
            i_r, i_z, i_n = jnp.split(gi, 3, -1)
            h_r, h_z, h_n = jnp.split(gh, 3, -1)
            r = jax.nn.sigmoid(i_r + h_r)
            z = jax.nn.sigmoid(i_z + h_z)
            n = jnp.tanh(i_n + r * h_n)
            h_new = (1.0 - z) * n + z * h
            return h_new, h_new
        h_last, h_all = lax.scan(step, h0, jnp.transpose(x_bse, (1, 0, 2)))
        return h_all, h_last

    enc, dec = params["enc"], params["dec"]
    B = src.shape[0]
    H = enc["w_hh"].shape[1]
    T = max_ans_letters - 1

    x_src = enc["emb"][src]
    _, h_enc = gru_scan(x_src, jnp.zeros((B, H), jnp.float32),
                        enc["w_ih"], enc["w_hh"], enc["b_ih"], enc["b_hh"])
    x_tgt = dec["emb"][tgt[:, :T]]
    h_all, _ = gru_scan(x_tgt, h_enc, dec["w_ih"], dec["w_hh"], dec["b_ih"], dec["b_hh"])
    gruout = jnp.transpose(h_all, (1, 0, 2))                  # (B, T, H)
    return gruout @ dec["w_out"].T + dec["b_out"]             # (B, T, V)


if __name__ == "__main__":
    src_vocab, tgt_vocab = 13, 13
    enc_emb_dim, enc_hid_dim = 16, 32
    dec_emb_dim, dec_hid_dim = 16, 32
    pad_idx, bos_idx, max_ans_letters = 0, 1, 9
    batch, src_len = 2, 8
    tgt_len = max_ans_letters

    key = jax.random.PRNGKey(0)
    k_params, k_src, k_tgt = jax.random.split(key, 3)
    params = init_params(k_params, src_vocab, tgt_vocab, enc_emb_dim, enc_hid_dim,
                         dec_emb_dim, dec_hid_dim, pad_idx)

    src = jax.random.randint(k_src, (batch, src_len), 2, src_vocab, dtype=jnp.int32)
    src = src.at[0, -2:].set(pad_idx)                     # include some padding tokens
    tgt = jax.random.randint(k_tgt, (batch, tgt_len), 2, tgt_vocab, dtype=jnp.int32)
    tgt = tgt.at[:, 0].set(bos_idx)

    logits = seq2seq_forward(params, src, tgt, max_ans_letters)
    logits = jax.block_until_ready(logits)

    ref = _reference_forward(params, src, tgt, max_ans_letters)
    assert logits.shape == (batch, max_ans_letters - 1, tgt_vocab), logits.shape
    max_err = float(jnp.max(jnp.abs(logits - ref)))
    assert jnp.allclose(logits, ref, atol=1e-4, rtol=1e-4), f"mismatch vs reference: {max_err}"

    print("KERNEL_OK")
</pallas_src>

<mosaic_0001>
module attributes {stable_mosaic.version = 11 : i64} {
  func.func @_dense_kernel(%arg0: i32, %arg1: memref<64x16xf32, #tpu.memory_space<vmem>>, %arg2: memref<16x384xf32, #tpu.memory_space<vmem>>, %arg3: memref<1x384xf32, #tpu.memory_space<vmem>>, %arg4: memref<64x384xf32, #tpu.memory_space<vmem>>) attributes {dimension_semantics = [#tpu.dimension_semantics<arbitrary>], iteration_bounds = array<i64: 1>, scalar_prefetch = 0 : i64, scratch_operands = 0 : i64, tpu.core_type = #tpu.core_type<tc>, window_params = [{pipeline_mode = #tpu.pipeline_mode<synchronous>, transform_indices = @transform_0, window_bounds = array<i64: 64, 16>}, {pipeline_mode = #tpu.pipeline_mode<synchronous>, transform_indices = @transform_1, window_bounds = array<i64: 16, 384>}, {pipeline_mode = #tpu.pipeline_mode<synchronous>, transform_indices = @transform_2, window_bounds = array<i64: 1, 384>}, {pipeline_mode = #tpu.pipeline_mode<synchronous>, transform_indices = @transform_3, window_bounds = array<i64: 64, 384>}]} {
    %c0 = arith.constant 0 : index
    %c0_0 = arith.constant 0 : index
    %0 = vector.load %arg1[%c0, %c0_0] : memref<64x16xf32, #tpu.memory_space<vmem>>, vector<64x16xf32>
    %c0_1 = arith.constant 0 : index
    %c0_2 = arith.constant 0 : index
    %1 = vector.load %arg2[%c0_1, %c0_2] : memref<16x384xf32, #tpu.memory_space<vmem>>, vector<16x384xf32>
    %cst = arith.constant dense<0.000000e+00> : vector<64x384xf32>
    %2 = tpu.matmul %0, %1, %cst {dimension_numbers = #tpu.dot_dimension_numbers<[1], [0], [0], [1], [0, 0, 1, 1], [], []>} : vector<64x16xf32>, vector<16x384xf32>, vector<64x384xf32> -> vector<64x384xf32>
    %c0_3 = arith.constant 0 : index
    %c0_4 = arith.constant 0 : index
    %3 = vector.load %arg3[%c0_3, %c0_4] : memref<1x384xf32, #tpu.memory_space<vmem>>, vector<1x384xf32>
    %4 = vector.broadcast %3 : vector<1x384xf32> to vector<64x384xf32>
    %5 = arith.addf %2, %4 : vector<64x384xf32>
    %c0_5 = arith.constant 0 : index
    %c0_6 = arith.constant 0 : index
    %6 = vector.load %arg4[%c0_5, %c0_6] : memref<64x384xf32, #tpu.memory_space<vmem>>, vector<64x384xf32>
    tpu.vector_store %arg4[%c0_5, %c0_6], %5 {strides = array<i32>} : memref<64x384xf32, #tpu.memory_space<vmem>>, vector<64x384xf32>,
    return
  }
  func.func @transform_0(%arg0: i32) -> (i32, i32) {
    %c0_i32 = arith.constant 0 : i32
    %c0_i32_0 = arith.constant 0 : i32
    %c0_i32_1 = arith.constant 0 : i32
    return %c0_i32, %c0_i32_0 : i32, i32
  }
  func.func @transform_1(%arg0: i32) -> (i32, i32) {
    %c0_i32 = arith.constant 0 : i32
    %c0_i32_0 = arith.constant 0 : i32
    %c0_i32_1 = arith.constant 0 : i32
    return %c0_i32, %c0_i32_0 : i32, i32
  }
  func.func @transform_2(%arg0: i32) -> (i32, i32) {
    %c0_i32 = arith.constant 0 : i32
    %c0_i32_0 = arith.constant 0 : i32
    %c0_i32_1 = arith.constant 0 : i32
    return %c0_i32, %c0_i32_0 : i32, i32
  }
  func.func @transform_3(%arg0: i32) -> (i32, i32) {
    %c0_i32 = arith.constant 0 : i32
    %c0_i32_0 = arith.constant 0 : i32
    %c0_i32_1 = arith.constant 0 : i32
    return %c0_i32, %c0_i32_0 : i32, i32
  }
}

</mosaic_0001>

<bundles_post_ra>
// kernel: tpu_custom_call.1
= control target key start
LH: loop header
LB: loop body
LE: loop exit
PB: predicated region body
PF: predicated region fallthrough
CT: control target
= control target key end

     0   :  { %v409_v5 = vmov 0.0   ;;  %vm46_vm0 = vcmask 130048   ;;  %s526_s0 = inlined_call_operand.vmem [shape: f32[64,16], index: 0, kind: input, shape index: {}]   ;;  %s527_s1 = inlined_call_operand.vmem [shape: f32[16,384], index: 1, kind: input, shape index: {}]   ;;  %s528_s2 = inlined_call_operand.vmem [shape: f32[1,384], index: 2, kind: input, shape index: {}]   ;;  %s529_s3 = inlined_call_operand.hbm [shape: f32[64,384], index: 3, kind: output, shape index: {}]  }
   0x1   :  { %v24_v0 = vld [vmem:[%s527_s1 + $0x8] sm:$0xff]  ;;  %v27_v1 = vld [vmem:[%s527_s1 + $0x20] sm:$0xff]  ;;  %v26_v4 = vld [vmem:[%s527_s1 + $0x18] sm:$0xff]  ;;  %135 = vmatprep.mubr.f32.mxu0 %v409_v5  ;;  %171 = vmatprep.mubr.f32.mxu1 %v409_v5 }
   0x2   :  { %v23_v2 = vld [vmem:[%s527_s1] sm:$0xff]  ;;  %v371_v3 = vpack.c.bf16 %v27_v1, %v24_v0  ;;  %v25_v7 = vld [vmem:[%s527_s1 + $0x10] sm:$0xff]  ;;  %v28_v8 = vld [vmem:[%s527_s1 + $0x28] sm:$0xff] }
   0x3   :  { %v373_v6 = vpack.c.bf16 %v26_v4, %v23_v2  ;;  %v375_v9 = vpack.c.bf16 %v28_v8, %v25_v7  ;;  %v15_v10 = vld [vmem:[%s526_s0] sm:$0xff]  ;;  %v21_v11 = vld [vmem:[%s526_s0 + $0x30] sm:$0xff] }
   0x4   :  { %372 = vmatprep.subr.bf16.mxu0 %v371_v3  ;;  %379 = vmatprep.subr.bf16.mxu1 %v371_v3 }
   0x5   :  { %374 = vmatpush1.bf16.msra.mxu0 %v373_v6  ;;  %380 = vmatpush1.bf16.msra.mxu1 %v373_v6 }
   0x6   :  { %376 = vmatprep.subr.bf16.mxu1 %v375_v9 }
   0x7   :  { %8 = vsyncpa [#allocation3], 0  ;;  %v16_v12 = vld [vmem:[%s526_s0 + $0x8] sm:$0xff]  ;;  %v22_v13 = vld [vmem:[%s526_s0 + $0x38] sm:$0xff]  ;;  %v31_v18 = vlaneseq }
   0x8   :  { %329 = vmatmul.mubr.msk.f32.vlgmr.msra.gmra.mrb[0].mxu0 %vm46_vm0, %v15_v10  ;;  %335 = vmatmul.mubr.msk.f32.vlgmr.msra.gmra.mrb[0].mxu1 %vm46_vm0, %v21_v11  ;;  %v17_v14 = vld [vmem:[%s526_s0 + $0x10] sm:$0xff]  ;;  %v18_v15 = vld [vmem:[%s526_s0 + $0x18] sm:$0xff]  ;;  %v19_v16 = vld [vmem:[%s526_s0 + $0x20] sm:$0xff] }
   0x9   :  { %378 = vmatpush3.bf16.msra.mxu1 %v375_v9  ;;  %141 = vmatprep.mubr.f32.mxu0 %v409_v5  ;;  %v20_v17 = vld [vmem:[%s526_s0 + $0x28] sm:$0xff]  ;;  %v32_v19 = vshrl.u32 %v31_v18, 7  ;;  %v29_v21 = vld [vmem:[%s528_s2] sm:$0x7]  ;;  %s410_s0 = smov [#allocation2]  }
   0xa   :  { %177 = vmatprep.mubr.f32.mxu1 %v409_v5  ;;  %s318_s2 = sshll.u32 %s410_s0, 4  ;;  %s319_s2 = int_to_ptr.vmem [resolvable:$true] %s318_s2 }
   0xb   :  { %v33_v20 = vsub.s32 0, %v32_v19  ;;  %v37_v22 = vsub.s32 1, %v32_v19  ;;  %v41_v31 = vsub.s32 2, %v32_v19  ;;  %s385_s14 = scalar_lea.vmem %s319_s2, 3072  ;;  %p390_p1 = scmp.lt.s32.totalorder %s319_s2, %s319_s2 }
   0xc   :  { %330 = vmatmul.mubr.msk.f32.gmra.mrb[2].mxu0 %vm46_vm0, %v16_v12  ;;  %336 = vmatmul.mubr.msk.f32.gmra.mrb[2].mxu1 %vm46_vm0, %v22_v13  ;;  %p386_p0 = scmp.ne.s32.totalorder %s319_s2, %s385_s14  ;;  %p391_p2 = scmp.lt.s32.totalorder %s385_s14, %s385_s14 }
   0xd   :  { %147 = vmatprep.mubr.f32.mxu0 %v409_v5  ;;  %359 = vmatprep.mubr.msk.f32.mxu1 %vm46_vm0, %v15_v10  ;;  %v494_v23 = vrot.slane %v29_v21, %v33_v20  ;;  %v496_v24 = vrot.slane %v29_v21, %v37_v22  ;;  %v42_v40 = vrot.slane %v29_v21, %v41_v31 }
   0xe   :  { %p392_p3 = por %p391_p2, %p390_p1 }
  0x10   :  { %331 = vmatmul.mubr.msk.f32.gmra.mrb[4].mxu0 %vm46_vm0, %v17_v14  ;;  %360 = vmatmul.mubr.msk.f32.vlgmr.msra.gmra.mrb[4].mxu1 %vm46_vm0, %v16_v12  ;;  %p393_p4 = pnand %p392_p3, %p386_p0 }
  0x11   :  { %153 = vmatprep.mubr.f32.mxu0 %v409_v5  ;;  %362 = vmatprep.mubr.msk.f32.mxu1 %vm46_vm0, %v17_v14 }
  0x14   :  { %332 = vmatmul.mubr.msk.f32.gmra.mrb[6].mxu0 %vm46_vm0, %v18_v15  ;;  %363 = vmatmul.mubr.msk.f32.gmra.mrb[6].mxu1 %vm46_vm0, %v18_v15 }
  0x15   :  { %159 = vmatprep.mubr.f32.mxu0 %v409_v5  ;;  %365 = vmatprep.mubr.msk.f32.mxu1 %vm46_vm0, %v19_v16 }
  0x18   :  { %333 = vmatmul.mubr.msk.f32.gmra.mrb[8].mxu0 %vm46_vm0, %v19_v16  ;;  %366 = vmatmul.mubr.msk.f32.gmra.mrb[8].mxu1 %vm46_vm0, %v20_v17 }
  0x19   :  { %165 = vmatprep.mubr.f32.mxu0 %v409_v5  ;;  %368 = vmatprep.mubr.msk.f32.mxu1 %vm46_vm0, %v21_v11 }
  0x1c   :  { %334 = vmatmul.mubr.msk.f32.gmra.mrb[10].mxu0 %vm46_vm0, %v20_v17  ;;  %369 = vmatmul.mubr.msk.f32.gmra.mrb[10].mxu1 %vm46_vm0, %v22_v13 }
  0xdb   :  { %v137_v25 = vpop.f32.mrb[0].mxu0  ;;  %v173_v26 = vpop.f32.mrb[0].mxu1 }
  0xdc   :  { %v138_v27 = vadd.f32 %v137_v25, %v494_v23  ;;  %v174_v28 = vadd.f32 %v173_v26, %v494_v23  ;;  %v139_v29 = vpop.f32.mrb[1].mxu0  ;;  %v175_v30 = vpop.f32.mrb[1].mxu1 }
  0xdd   :  { %v140_v32 = vadd.f32 %v139_v29, %v496_v24  ;;  %v176_v33 = vadd.f32 %v175_v30, %v496_v24 }
  0xde   :  { %289 = vst [vmem:[#allocation2] sm:$0xff] %v138_v27  ;;  %307 = vst [vmem:[#allocation2 + $0x90] sm:$0xff] %v174_v28 }
  0xdf   :  { %290 = vst [vmem:[#allocation2 + $0x8] sm:$0xff] %v140_v32  ;;  %308 = vst [vmem:[#allocation2 + $0x98] sm:$0xff] %v176_v33  ;;  %v143_v34 = vpop.f32.mrb[2].mxu0  ;;  %v179_v35 = vpop.f32.mrb[2].mxu1 }
  0xe0   :  { %v144_v36 = vadd.f32 %v143_v34, %v494_v23  ;;  %v180_v37 = vadd.f32 %v179_v35, %v494_v23  ;;  %v145_v38 = vpop.f32.mrb[3].mxu0  ;;  %v181_v39 = vpop.f32.mrb[3].mxu1 }
  0xe1   :  { %v146_v41 = vadd.f32 %v145_v38, %v496_v24  ;;  %v182_v42 = vadd.f32 %v181_v39, %v496_v24 }
  0xe2   :  { %292 = vst [vmem:[#allocation2 + $0x18] sm:$0xff] %v144_v36  ;;  %310 = vst [vmem:[#allocation2 + $0xa8] sm:$0xff] %v180_v37 }
  0xe3   :  { %293 = vst [vmem:[#allocation2 + $0x20] sm:$0xff] %v146_v41  ;;  %311 = vst [vmem:[#allocation2 + $0xb0] sm:$0xff] %v182_v42  ;;  %v149_v43 = vpop.f32.mrb[4].mxu0  ;;  %v361_v44 = vpop.f32.mrb[4].mxu1 }
  0xe4   :  { %v150_v45 = vadd.f32 %v149_v43, %v494_v23  ;;  %v256_v46 = vadd.f32 %v361_v44, %v42_v40  ;;  %v151_v47 = vpop.f32.mrb[5].mxu0  ;;  %v250_v48 = vpop.f32.mrb[5].mxu1 }
  0xe5   :  { %v152_v49 = vadd.f32 %v151_v47, %v496_v24  ;;  %v251_v50 = vadd.f32 %v250_v48, %v42_v40 }
  0xe6   :  { %295 = vst [vmem:[#allocation2 + $0x30] sm:$0xff] %v150_v45  ;;  %294 = vst [vmem:[#allocation2 + $0x28] sm:$0xff] %v256_v46 }
  0xe7   :  { %296 = vst [vmem:[#allocation2 + $0x38] sm:$0xff] %v152_v49  ;;  %291 = vst [vmem:[#allocation2 + $0x10] sm:$0xff] %v251_v50  ;;  %v155_v51 = vpop.f32.mrb[6].mxu0  ;;  %v364_v52 = vpop.f32.mrb[6].mxu1 }
  0xe8   :  { %v156_v53 = vadd.f32 %v155_v51, %v494_v23  ;;  %v266_v54 = vadd.f32 %v364_v52, %v42_v40  ;;  %v157_v55 = vpop.f32.mrb[7].mxu0  ;;  %v260_v56 = vpop.f32.mrb[7].mxu1 }
  0xe9   :  { %v158_v57 = vadd.f32 %v157_v55, %v496_v24  ;;  %v261_v58 = vadd.f32 %v260_v56, %v42_v40 }
  0xea   :  { %298 = vst [vmem:[#allocation2 + $0x48] sm:$0xff] %v156_v53  ;;  %300 = vst [vmem:[#allocation2 + $0x58] sm:$0xff] %v266_v54 }
  0xeb   :  { %299 = vst [vmem:[#allocation2 + $0x50] sm:$0xff] %v158_v57  ;;  %297 = vst [vmem:[#allocation2 + $0x40] sm:$0xff] %v261_v58  ;;  %v161_v59 = vpop.f32.mrb[8].mxu0  ;;  %v367_v60 = vpop.f32.mrb[8].mxu1 }
  0xec   :  { %v162_v61 = vadd.f32 %v161_v59, %v494_v23  ;;  %v276_v62 = vadd.f32 %v367_v60, %v42_v40  ;;  %v163_v63 = vpop.f32.mrb[9].mxu0  ;;  %v270_v0 = vpop.f32.mrb[9].mxu1 }
  0xed   :  { %v164_v1 = vadd.f32 %v163_v63, %v496_v24  ;;  %v271_v2 = vadd.f32 %v270_v0, %v42_v40 }
  0xee   :  { %301 = vst [vmem:[#allocation2 + $0x60] sm:$0xff] %v162_v61  ;;  %306 = vst [vmem:[#allocation2 + $0x88] sm:$0xff] %v276_v62 }
  0xef   :  { %302 = vst [vmem:[#allocation2 + $0x68] sm:$0xff] %v164_v1  ;;  %303 = vst [vmem:[#allocation2 + $0x70] sm:$0xff] %v271_v2  ;;  %v167_v3 = vpop.f32.mrb[10].mxu0  ;;  %v370_v4 = vpop.f32.mrb[10].mxu1 }
  0xf0   :  { %v168_v5 = vadd.f32 %v167_v3, %v494_v23  ;;  %v286_v6 = vadd.f32 %v370_v4, %v42_v40  ;;  %v169_v7 = vpop.f32.mrb[11].mxu0  ;;  %v280_v8 = vpop.f32.mrb[11].mxu1 }
  0xf1   :  { %v170_v9 = vadd.f32 %v169_v7, %v496_v24  ;;  %v281_v10 = vadd.f32 %v280_v8, %v42_v40 }
  0xf2   :  { %304 = vst [vmem:[#allocation2 + $0x78] sm:$0xff] %v168_v5  ;;  %312 = vst [vmem:[#allocation2 + $0xb8] sm:$0xff] %v286_v6 }
  0xf3   :  { %305 = vst [vmem:[#allocation2 + $0x80] sm:$0xff] %v170_v9  ;;  %309 = vst [vmem:[#allocation2 + $0xa0] sm:$0xff] %v281_v10 }
  0xf4   :  { %396 = shalt.err (!%p393_p4)
}
  0xf5   :  { %s397_s17 = scalar_lea.hbm %s529_s3, 3072 }
  0xf6   :  { %p398_p5 = scmp.ne.s32.totalorder %s529_s3, %s397_s17  ;;  %p401_p6 = scmp.lt.u32.totalorder %s397_s17, %s529_s3 }
  0xf8   :  { %p403_p7 = pnand %p401_p6, %p398_p5 }
  0xfa   :  { %406 = shalt.err (!%p403_p7)
}
  0xfb   :  { %s411_s22 = smov 384   ;;  %s412_s23 = smov 24  }
  0xfc   :  { %324 = dma.vmem_to_hbm [thread:$0]  %s319_s2, 3072, %s529_s3, [#allocation3], %s411_s22, %s411_s22, %s412_s23  }
  0xfd   :  { %407 = dma.done.wait [#allocation3], 3072  }
  0xfe   :  { %408 = vsyncadd [#allocation3], 4294964224 }
  0xff   :  { %328 = vsyncpa [#allocation3], 1 }

</bundles_post_ra>
